<compile_context>
chip_gen: v7x
topology: tpu7x:2x2x1
jax: 0.10.0
libtpu: 0.0.40
codegen_flags: <defaults>
</compile_context>

<pallas_src>
import jax
import jax.numpy as jnp
from jax.experimental import pallas as pl
from jax.experimental.pallas import tpu as pltpu


def _round_down(n: int, m: int) -> int:
    return n // m * m


def _subject_layers_kernel(subj_ref, x_ref, w_ref, o_ref):
    # subj_ref: SMEM (B,) int32 scalar-prefetch (consumed by the index_maps only).
    # x_ref: VMEM (C, tT), w_ref: VMEM (D, C), o_ref: VMEM (D, tT).
    # out[d, t] = sum_c w[d, c] * x[c, t]  (LHS contraction last, RHS contraction
    # on sublanes -> no in-kernel transposes; accumulate in f32 on the MXU).
    del subj_ref
    o_ref[...] = jax.lax.dot_general(
        w_ref[...], x_ref[...],
        dimension_numbers=(((1,), (0,)), ((), ())),
        preferred_element_type=jnp.float32,
    ).astype(o_ref.dtype)


def _vmem_capacity_bytes() -> int:
    try:
        return int(pltpu.get_tpu_info().vmem_capacity_bytes)
    except Exception:
        return 64 << 20  # conservative fallback (v7x per-TC capacity)


def subject_layers(x, subjects, weights, *, operand_dtype=None,
                   t_tile_cap: int = 2048, vmem_budget_bytes=None):
    """Per-subject linear layer.

    x: (B, C, T), subjects: (B,) int, weights: (S, C, D)  ->  (B, D, T)
    out[b, d, t] = sum_c x[b, c, t] * weights[subjects[b], c, d]

    operand_dtype: dtype for x/weights inside the kernel (default x.dtype).
      bf16 is recommended for memory-bound production shapes; the output keeps
      x.dtype and the MXU always accumulates in f32.
    """
    B, C, T = x.shape
    S, Cw, D = weights.shape
    assert Cw == C, "weights in_channels must match x channels"

    out_dtype = x.dtype
    operand_dtype = jnp.dtype(x.dtype if operand_dtype is None else operand_dtype)
    op_b = operand_dtype.itemsize
    out_b = jnp.dtype(out_dtype).itemsize

    # Out-of-range subject ids are clipped (PyTorch gather would raise); this is
    # a safety net against an OOB weight DMA, not a semantic feature.
    subjects = jnp.clip(subjects.astype(jnp.int32), 0, S - 1)

    # Cast operands once (no-op when operand_dtype == input dtype) and do the
    # one-time transpose to (S, D, C) so the kernel never transposes weights.
    x_op = x.astype(operand_dtype)
    w_op = jnp.transpose(weights.astype(operand_dtype), (0, 2, 1))

    # ----- generation-aware tile sizing / VMEM budgeting -----
    vmem_cap = _vmem_capacity_bytes()
    if vmem_budget_bytes is None:
        vmem_budget_bytes = int(vmem_cap * 0.4)      # leave room for pipeline + scratch
    cap = max(128, _round_down(int(t_tile_cap), 128))
    # Per time-column bytes: double-buffered x and out tiles + f32 matmul intermediate.
    per_col = 2 * C * op_b + 2 * D * out_b + 4 * D
    w_slab = 2 * C * D * op_b                        # double-buffered weight slab
    avail = max(vmem_budget_bytes - w_slab, per_col * 128)   # never emit < one 128 tile
    tT = min(cap, max(128, _round_down(avail // per_col, 128)))
    if T <= tT:
        tT, t_tiles = T, 1            # single full-T tile (full-dim block, always legal)
    else:
        t_tiles = pl.cdiv(T, tT)      # ragged last tile: OOB reads unused, OOB writes dropped

    # Megacore (v7x): leading size-2 "parallel" axis over the time tiles so both
    # TensorCores get work even when B is tiny/odd. Only when tiles split evenly.
    n_split = 2 if (t_tiles >= 2 and t_tiles % 2 == 0) else 1
    tps = t_tiles // n_split
    grid = (n_split, B, tps)          # inner time axis keeps the weight block index fixed

    working = per_col * tT + w_slab
    vmem_limit = int(min(vmem_cap, max(2 * working, 16 << 20)))

    out = pl.pallas_call(
        _subject_layers_kernel,
        out_shape=jax.ShapeDtypeStruct((B, D, T), out_dtype),
        grid_spec=pltpu.PrefetchScalarGridSpec(
            num_scalar_prefetch=1,
            grid=grid,
            in_specs=[
                # x: one (C, tT) time tile per grid step.
                pl.BlockSpec((pl.Squeezed(), C, tT),
                             lambda s, b, t, subj, _tps=tps: (b, 0, s * _tps + t)),
                # weights: data-dependent gather of the subject's (D, C) slab;
                # index ignores the inner time axis -> re-DMA only when b changes.
                pl.BlockSpec((pl.Squeezed(), D, C),
                             lambda s, b, t, subj: (subj[b], 0, 0)),
            ],
            out_specs=pl.BlockSpec((pl.Squeezed(), D, tT),
                                   lambda s, b, t, subj, _tps=tps: (b, 0, s * _tps + t)),
        ),
        compiler_params=pltpu.CompilerParams(
            dimension_semantics=("parallel", "parallel", "arbitrary"),
            vmem_limit_bytes=vmem_limit,
        ),
        cost_estimate=pl.CostEstimate(
            flops=2 * B * C * D * T,
            transcendentals=0,
            bytes_accessed=B * C * T * op_b + B * D * T * out_b
            + n_split * min(B, S) * C * D * op_b,
        ),
    )(subjects, x_op, w_op)
    return out


if __name__ == "__main__":
    key = jax.random.PRNGKey(0)
    ks = jax.random.split(key, 9)

    def ref(x, subjects, weights):
        return jnp.einsum('bct,bcd->bdt', x, weights[subjects])

    # 1) Small shapes consistent with the module (f32, single time tile).
    B, C, D, T, S = 2, 4, 4, 16, 3
    w1 = jax.random.normal(ks[0], (S, C, D), jnp.float32) / C ** 0.5
    x1 = jax.random.normal(ks[1], (B, C, T), jnp.float32)
    s1 = jax.random.randint(ks[2], (B,), 0, S, dtype=jnp.int32)
    o1 = jax.block_until_ready(subject_layers(x1, s1, w1))
    assert o1.shape == (B, D, T)
    assert jnp.allclose(o1, ref(x1, s1, w1), atol=1e-4, rtol=1e-4), "mismatch (small)"

    # 2) Non-aligned C/D/T, single time tile, no padding anywhere.
    B, C, D, T, S = 3, 20, 12, 300, 4
    w2 = jax.random.normal(ks[3], (S, C, D), jnp.float32) / C ** 0.5
    x2 = jax.random.normal(ks[4], (B, C, T), jnp.float32)
    s2 = jax.random.randint(ks[5], (B,), 0, S, dtype=jnp.int32)
    o2 = jax.block_until_ready(subject_layers(x2, s2, w2))
    assert jnp.allclose(o2, ref(x2, s2, w2), atol=1e-4, rtol=1e-4), "mismatch (unaligned)"

    # 3) Forced multi-tile with a ragged last time tile (128/128/44).
    o3 = jax.block_until_ready(subject_layers(x2, s2, w2, t_tile_cap=128))
    assert jnp.allclose(o3, ref(x2, s2, w2), atol=1e-4, rtol=1e-4), "mismatch (ragged T tile)"

    # 4) Even tile count -> size-2 leading parallel axis (megacore split over T).
    B, C, D, T, S = 2, 16, 24, 512, 3
    w4 = jax.random.normal(ks[6], (S, C, D), jnp.float32) / C ** 0.5
    x4 = jax.random.normal(ks[7], (B, C, T), jnp.float32)
    s4 = jax.random.randint(ks[8], (B,), 0, S, dtype=jnp.int32)
    o4 = jax.block_until_ready(subject_layers(x4, s4, w4, t_tile_cap=128))
    assert jnp.allclose(o4, ref(x4, s4, w4), atol=1e-4, rtol=1e-4), "mismatch (split T axis)"

    # 5) bf16 operands (recommended for memory-bound shapes), f32 accumulate/output.
    o5 = jax.block_until_ready(
        subject_layers(x4, s4, w4, operand_dtype=jnp.bfloat16, t_tile_cap=128))
    ref5 = ref(x4.astype(jnp.bfloat16).astype(jnp.float32), s4,
               w4.astype(jnp.bfloat16).astype(jnp.float32))
    assert o5.dtype == jnp.float32
    assert jnp.allclose(o5, ref5, atol=5e-2, rtol=5e-2), "mismatch (bf16 operands)"

    print("KERNEL_OK")
</pallas_src>

<mosaic_0001>
module attributes {stable_mosaic.version = 11 : i64} {
  func.func @_subject_layers_kernel(%arg0: i32, %arg1: i32, %arg2: i32, %arg3: memref<2xi32, #tpu.memory_space<smem>>, %arg4: memref<1x4x16xf32, #tpu.memory_space<vmem>>, %arg5: memref<1x4x4xf32, #tpu.memory_space<vmem>>, %arg6: memref<1x4x16xf32, #tpu.memory_space<vmem>>) attributes {dimension_semantics = [#tpu.dimension_semantics<parallel>, #tpu.dimension_semantics<parallel>, #tpu.dimension_semantics<arbitrary>], iteration_bounds = array<i64: 1, 2, 1>, scalar_prefetch = 1 : i64, scratch_operands = 0 : i64, tpu.core_type = #tpu.core_type<tc>, window_params = [{transform_indices = @transform_0, window_bounds = array<i64: 1, 4, 16>}, {transform_indices = @transform_1, window_bounds = array<i64: 1, 4, 4>}, {transform_indices = @transform_2, window_bounds = array<i64: 1, 4, 16>}]} {
    %c0 = arith.constant 0 : index
    %c0_0 = arith.constant 0 : index
    %c0_1 = arith.constant 0 : index
    %0 = vector.load %arg5[%c0, %c0_0, %c0_1] : memref<1x4x4xf32, #tpu.memory_space<vmem>>, vector<1x4x4xf32>
    %1 = vector.shape_cast %0 : vector<1x4x4xf32> to vector<4x4xf32>
    %c0_2 = arith.constant 0 : index
    %c0_3 = arith.constant 0 : index
    %c0_4 = arith.constant 0 : index
    %2 = vector.load %arg4[%c0_2, %c0_3, %c0_4] : memref<1x4x16xf32, #tpu.memory_space<vmem>>, vector<1x4x16xf32>
    %3 = vector.shape_cast %2 : vector<1x4x16xf32> to vector<4x16xf32>
    %cst = arith.constant dense<0.000000e+00> : vector<4x16xf32>
    %4 = tpu.matmul %1, %3, %cst {dimension_numbers = #tpu.dot_dimension_numbers<[1], [0], [0], [1], [0, 0, 1, 1], [], []>} : vector<4x4xf32>, vector<4x16xf32>, vector<4x16xf32> -> vector<4x16xf32>
    %c0_5 = arith.constant 0 : index
    %c0_6 = arith.constant 0 : index
    %c0_7 = arith.constant 0 : index
    %5 = vector.load %arg6[%c0_5, %c0_6, %c0_7] : memref<1x4x16xf32, #tpu.memory_space<vmem>>, vector<1x4x16xf32>
    %6 = vector.shape_cast %5 : vector<1x4x16xf32> to vector<4x16xf32>
    %7 = vector.shape_cast %4 : vector<4x16xf32> to vector<1x4x16xf32>
    tpu.vector_store %arg6[%c0_5, %c0_6, %c0_7], %7 {strides = array<i32>} : memref<1x4x16xf32, #tpu.memory_space<vmem>>, vector<1x4x16xf32>,
    return
  }
  func.func @transform_0(%arg0: i32, %arg1: i32, %arg2: i32, %arg3: memref<2xi32, #tpu.memory_space<smem>>) -> (i32, i32, i32) {
    %c1_i32 = arith.constant 1 : i32
    %0 = arith.muli %arg0, %c1_i32 : i32
    %1 = arith.addi %0, %arg2 : i32
    %c0_i32 = arith.constant 0 : i32
    %c0_i32_0 = arith.constant 0 : i32
    return %arg1, %c0_i32, %1 : i32, i32, i32
  }
  func.func @transform_1(%arg0: i32, %arg1: i32, %arg2: i32, %arg3: memref<2xi32, #tpu.memory_space<smem>>) -> (i32, i32, i32) {
    %0 = arith.index_cast %arg1 : i32 to index
    %1 = memref.load %arg3[%0] : memref<2xi32, #tpu.memory_space<smem>>
    %c0_i32 = arith.constant 0 : i32
    %c0_i32_0 = arith.constant 0 : i32
    %c0_i32_1 = arith.constant 0 : i32
    return %1, %c0_i32, %c0_i32_0 : i32, i32, i32
  }
  func.func @transform_2(%arg0: i32, %arg1: i32, %arg2: i32, %arg3: memref<2xi32, #tpu.memory_space<smem>>) -> (i32, i32, i32) {
    %c1_i32 = arith.constant 1 : i32
    %0 = arith.muli %arg0, %c1_i32 : i32
    %1 = arith.addi %0, %arg2 : i32
    %c0_i32 = arith.constant 0 : i32
    %c0_i32_0 = arith.constant 0 : i32
    return %arg1, %c0_i32, %1 : i32, i32, i32
  }
}

</mosaic_0001>

<bundles_post_ra>
// kernel: tpu_custom_call.1
= control target key start
LH: loop header
LB: loop body
LE: loop exit
PB: predicated region body
PF: predicated region fallthrough
CT: control target
= control target key end

     0   :  { %s1084_s0 = inlined_call_operand.hbm [shape: s32[2], index: 0, kind: input, shape index: {}]   ;;  %s1085_s1 = inlined_call_operand.hbm [shape: f32[2,4,16], index: 1, kind: input, shape index: {}]   ;;  %s1086_s2 = inlined_call_operand.hbm [shape: f32[3,4,4], index: 2, kind: input, shape index: {}]   ;;  %s1087_s3 = inlined_call_operand.hbm [shape: f32[2,4,16], index: 3, kind: output, shape index: {}]  }
   0x1   :  { %1094 = sst [smem:[#allocation17_spill]] %s1085_s1  ;;  %s565_s14 = scalar_lea.hbm %s1084_s0, 16 }
   0x2   :  { %p566_p0 = scmp.ne.s32.totalorder %s1084_s0, %s565_s14  ;;  %p569_p1 = scmp.lt.u32.totalorder %s565_s14, %s1084_s0 }
   0x4   :  { %p571_p2 = pnand %p569_p1, %p566_p0 }
   0x6   :  { %574 = shalt.err (!%p571_p2)  }
   0x7   :  { %s749_s19 = smov [#allocation3]  }
   0x8   :  { %9 = dma.hbm_to_smem %s1084_s0, 16, %s749_s19, [#allocation2] }
   0x9   :  { %699 = dma.done.wait [#allocation2], 16 }
   0xa   :  { %700 = vsyncadd [#allocation2], 4294967280 }
   0xb   :  { %11 = sfence }
   0xc   :  { %12 = vsyncpa [#allocation5], 0 }
   0xd   :  { %14 = vsyncpa [#allocation5 + $0x1], 0 }
   0xe   :  { %15 = vsyncpa [#allocation8], 0 }
   0xf   :  { %17 = vsyncpa [#allocation8 + $0x1], 0 }
  0x10   :  { %18 = vsyncpa [#allocation6], 0 }
  0x11   :  { %20 = vsyncpa [#allocation6 + $0x1], 0  ;;  %s787_s22 = smov 0   ;;  %s789_s23 = smov 0  }
  0x12   :  { %s791_s24 = smov 0   ;;  %s793_s25 = smov 0  }
  0x13   :  { %s795_s26 = smov 0   ;;  %s797_s0 = smov 0  }
  0x14   :  { %s799_s27 = smov 0   ;;  %s801_s28 = smov 0  }
  0x15   :  { %s803_s29 = smov 0  }
  0x16 LB: > { %s442_s30 = sadd.s32 4294967295, %s747_s29   ;;  %s443_s4 = sadd.s32 4294967294, %s747_s29   ;;  %s747_s29 = sphi %s803_s29, %s26_s29   ;;  %s743_s28 = sphi %s801_s28, %s1125_s28   ;;  %s739_s27 = sphi %s799_s27, %s1124_s27   ;;  %s735_s0 = sphi %s797_s0, %s1123_s0   ;;  %s731_s26 = sphi %s795_s26, %s1122_s26   ;;  %s727_s25 = sphi %s793_s25, %s1121_s25   ;;  %s723_s24 = sphi %s791_s24, %s1120_s24   ;;  %s719_s23 = sphi %s789_s23, %s1119_s23   ;;  %s715_s22 = sphi %s787_s22, %s1118_s22  }
  0x17   : > { %s41_s5 = sadd.s32 1, %s743_s28  ;;  %s56_s6 = sadd.s32 1, %s735_s0 }
  0x18   : > { %p43_p3 = scmp.ge.s32.totalorder %s41_s5, 2  ;;  %p63_p4 = scmp.ne.s32.totalorder %s735_s0, %s731_s26 }
  0x19   : > { %p1089_p5 = scmp.eq.s32.totalorder %s747_s29, 0  ;;  %p69_p6 = scmp.ne.s32.totalorder %s731_s26, %s727_s25 }
  0x1a   : > { %s1127_s5 = smov (%p43_p3, %s41_s5), 0  ;;  %p852_p8 = scmp.eq.s32.totalorder %s442_s30, 0 }
  0x1b   : > { %1095 = sst [smem:[#allocation16_spill]] %s1127_s5  ;;  %p848_p7 = por %p1089_p5, %p63_p4 }
  0x1c   : > { %s51_s9 = ssub.s32 %s743_s28, %s1127_s5  ;;  %s859_s10 = sld [smem:[#allocation3 + %s743_s28]] }
  0x1d   : > { %p54_p9 = scmp.eq.s32.totalorder %s51_s9, 0  ;;  %p866_p10 = por %p852_p8, %p69_p6 }
  0x1e   : > { %s871_s12 = sld [smem:[#allocation3 + %s1127_s5]]  ;;  %p125_p11 = scmp.eq.s32.totalorder %s442_s30, 1 }
  0x1f   : > { %s1098_s11 = scalar_select %p866_p10, 1, 0 }
  0x20   : > { %s874_s13 = scalar_select %p54_p9, %s735_s0, %s56_s6  }
  0x21   : > { %p879_p12 = por %p125_p11, %p63_p4  ;;  %p131_p13 = scmp.eq.s32.totalorder %s443_s4, 1 }
  0x22   : > { %p1088_p1 = scmp.lt.s32.totalorder %s747_s29, 2  ;;  %s151_s16 = sand.u32 1, %s735_s0  }
  0x23   : > { %s1099_s14 = scalar_select %p879_p12, 1, 0 }
  0x24   : > { %p888_p2 = por %p131_p13, %p69_p6  ;;  %s446_s17 = sshll.u32 %s151_s16, 2 }
  0x25   : > { %s447_s18 = sshll.u32 %s743_s28, 6  ;;  %s1101_s1 = sld [smem:[#allocation17_spill]] }
  0x26   : > { %s1100_s15 = scalar_select %p888_p2, 1, 0 }
  0x27   : > { %s155_s30 = scalar_lea.vmem [#allocation4], %s446_s17  ;;  %p905_p3 = pnand %p1088_p1, %p848_p7 }
  0x28   : > { %s164_s4 = sshll.u32 %s155_s30, 4  ;;  %s152_s9 = scalar_lea.sflag [#allocation5], %s151_s16  ;;  %s899_s4 = int_to_ptr.vmem [resolvable:$true] %s164_s4 }
  0x29   : > { %p577_p11 = pneg %p905_p3 }
  0x2b   : > { %s897_s21 = scalar_lea.hbm %s1101_s1, %s447_s18  ;;  %s580_s19 = scalar_lea.hbm %s1101_s1, 128 }
  0x2c   : > { %s575_s18 = scalar_lea.hbm %s897_s21, 64  ;;  %p581_p7 = scmp.lt.u32.totalorder %s897_s21, %s1101_s1 }
  0x2d   : > { %p576_p9 = scmp.ne.s32.totalorder %s897_s21, %s575_s18  ;;  %p582_p1 = scmp.lt.u32.totalorder %s580_s19, %s575_s18 }
  0x2e   : > { %p584_p4 = scmp.lt.u32.totalorder %s575_s18, %s897_s21 }
  0x2f   : > { %p578_p13 = pnand %p577_p11, %p576_p9  ;;  %p583_p5 = por %p582_p1, %p581_p7 }
  0x31   : > { %p579_p0 = pneg %p578_p13  ;;  %p585_p6 = por %p584_p4, %p583_p5 }
  0x33   : > { %p586_p2 = pnand %p585_p6, %p579_p0 }
  0x35   : > { %589 = shalt.err (!%p586_p2)
}
  0x36   : > { %s590_s16 = scalar_lea.vmem %s899_s4, 64  ;;  %s750_s17 = smov [#allocation4]  }
  0x37   : > { %p591_p9 = scmp.ne.s32.totalorder %s899_s4, %s590_s16  ;;  %s595_s7 = sshll.u32 %s750_s17, 4  ;;  %s596_s7 = int_to_ptr.vmem [resolvable:$false] %s595_s7 }
  0x38   : > { %s597_s20 = scalar_lea.vmem %s596_s7, 128  ;;  %p598_p10 = scmp.lt.s32.totalorder %s899_s4, %s596_s7 }
  0x39   : > { %p593_p13 = pnand %p591_p9, %p577_p11  ;;  %p599_p1 = scmp.lt.s32.totalorder %s597_s20, %s590_s16 }
  0x3b   : > { %p594_p12 = pneg %p593_p13  ;;  %p600_p7 = por %p599_p1, %p598_p10 }
  0x3d   : > { %p601_p5 = pnand %p600_p7, %p594_p12 }
  0x3f   : > { %604 = shalt.err (!%p601_p5)
}
  0x40   : > { %478 = dma.hbm_to_vmem [thread:$0]  (!%p905_p3), %s897_s21, 64, %s899_s4, %s152_s9  }
  0x41   : > { %p1103_p10 = scmp.lt.s32.totalorder %s747_s29, 3  ;;  %p1104_p12 = scmp.ge.s32.totalorder %s747_s29, 1 }
  0x42   : > { %s81_s18 = ssub.s32 %s859_s10, %s871_s12  ;;  %s84_s19 = sadd.s32 1, %s723_s24 }
  0x43   : > { %p940_p0 = pnand %p1104_p12, %p1103_p10  ;;  %p82_p2 = scmp.eq.s32.totalorder %s81_s18, 0 }
  0x44   : > { %p91_p4 = scmp.ne.s32.totalorder %s723_s24, %s719_s23  ;;  %p97_p6 = scmp.ne.s32.totalorder %s719_s23, %s715_s22 }
  0x45   : > { %s171_s30 = sand.u32 1, %s723_s24   ;;  %p1106_p11 = scmp.eq.s32.totalorder %s747_s29, 0 }
  0x46   : > { %s953_s16 = scalar_select %p82_p2, %s723_s24, %s84_s19  }
  0x47   : > { %p93_p9 = por %p91_p4, %p1106_p11  ;;  %p959_p13 = por %p97_p6, %p852_p8 }
  0x48   : > { %s448_s4 = sshll.u32 %s171_s30, 2  ;;  %p1108_p3 = scmp.lt.s32.totalorder %s747_s29, 2 }
  0x49   : > { %s1107_s21 = scalar_select %p959_p13, 1, 0 }
  0x4a   : > { %p965_p1 = pnand %p1108_p3, %p93_p9  ;;  %p1110_p7 = pmov %p1108_p3 }
  0x4b   : > { %s468_s10 = scalar_select %p93_p9, [#allocation3], [#allocation10] }
  0x4c   : > { %s469_s22 = scalar_select %p93_p9, %s743_s28, 0 }
  0x4d   : > { %s1129_s10 = smov (!%p1110_p7, %s468_s10), [#allocation11]  ;;  %p1111_p5 = pmov %p1108_p3 }
  0x4e   : > { %s175_s8 = scalar_lea.vmem [#allocation7], %s448_s4  ;;  %s172_s1 = scalar_lea.sflag [#allocation8], %s171_s30 }
  0x4f   : > { %s1131_s22 = smov (!%p1111_p5, %s469_s22), 0  ;;  %s183_s17 = sshll.u32 %s175_s8, 4  ;;  %s974_s17 = int_to_ptr.vmem [resolvable:$true] %s183_s17 }
  0x50   : > { %s176_s12 = sld [smem:[%s1129_s10 + %s1131_s22]]  ;;  %p607_p10 = pneg %p965_p1 }
  0x51   : > { %s610_s22 = scalar_lea.hbm %s1086_s2, 192 }
  0x56   : > { %s449_s7 = sshll.u32 %s176_s12, 6 }
  0x57   : > { %s979_s19 = scalar_lea.hbm %s1086_s2, %s449_s7 }
  0x58   : > { %s605_s5 = scalar_lea.hbm %s979_s19, 64  ;;  %p611_p4 = scmp.lt.u32.totalorder %s979_s19, %s1086_s2 }
  0x59   : > { %p606_p8 = scmp.ne.s32.totalorder %s979_s19, %s605_s5  ;;  %p612_p6 = scmp.lt.u32.totalorder %s610_s22, %s605_s5 }
  0x5a   : > { %p614_p9 = scmp.lt.u32.totalorder %s605_s5, %s979_s19 }
  0x5b   : > { %p608_p12 = pnand %p607_p10, %p606_p8  ;;  %p613_p11 = por %p612_p6, %p611_p4 }
  0x5d   : > { %p609_p2 = pneg %p608_p12  ;;  %p615_p3 = por %p614_p9, %p613_p11 }
  0x5f   : > { %p616_p7 = pnand %p615_p3, %p609_p2 }
  0x61   : > { %619 = shalt.err (!%p616_p7)
}
  0x62   : > { %s620_s30 = scalar_lea.vmem %s974_s17, 64  ;;  %s751_s7 = smov [#allocation7]  }
  0x63   : > { %p621_p5 = scmp.ne.s32.totalorder %s974_s17, %s620_s30  ;;  %s625_s20 = sshll.u32 %s751_s7, 4  ;;  %s626_s20 = int_to_ptr.vmem [resolvable:$false] %s625_s20 }
  0x64   : > { %s627_s18 = scalar_lea.vmem %s626_s20, 128  ;;  %p628_p13 = scmp.lt.s32.totalorder %s974_s17, %s626_s20 }
  0x65   : > { %p623_p8 = pnand %p621_p5, %p607_p10  ;;  %p629_p4 = scmp.lt.s32.totalorder %s627_s18, %s620_s30 }
  0x67   : > { %p624_p12 = pneg %p623_p8  ;;  %p630_p6 = por %p629_p4, %p628_p13 }
  0x69   : > { %p631_p11 = pnand %p630_p6, %p624_p12 }
  0x6b   : > { %634 = shalt.err (!%p631_p11)
}
  0x6c   : > { %483 = dma.hbm_to_vmem [thread:$0]  (!%p965_p1), %s979_s19, 64, %s974_s17, %s172_s1  }
  0x6d   : > { %192 = sbr.rel (%p940_p0) target bundleno = 350 (0x15e), region = 28  ;;  %s1009_s5 = sand.u32 (!%p940_p0), 1, %s731_s26  }
  0x6e   : > { %s451_s4 = sshll.u32 (!%p940_p0), %s1009_s5, 2  ;;  %s195_s10 = scalar_lea.sflag (!%p940_p0), [#allocation5], %s1009_s5 }
  0x6f   : > { %s198_s22 = scalar_lea.vmem (!%p940_p0), [#allocation4], %s451_s4  ;;  %p1112_p13 = scmp.ne.s32.totalorder (!%p940_p0), %s1098_s11, 0 }
  0x74   : > { %702 = dma.done.wait (%p1112_p13), %s195_s10, 64  }
  0x75   : > { %704 = vsyncadd (%p1112_p13), %s195_s10, 4294967232  ;;  %s203_s1 = sand.u32 1, %s719_s23   ;;  %p1113_p0 = scmp.ne.s32.totalorder %s1107_s21, 0 }
  0x76   : > { %s452_s9 = sshll.u32 %s203_s1, 2  ;;  %s204_s6 = scalar_lea.sflag [#allocation8], %s203_s1 }
  0x77   : > { %s207_s17 = scalar_lea.vmem [#allocation7], %s452_s9 }
  0x78   : > { %706 = dma.done.wait (%p1113_p0), %s204_s6, 64  }
  0x79   : > { %708 = vsyncadd (%p1113_p0), %s204_s6, 4294967232  ;;  %v752_v0 = vmov 0.0   ;;  %vm753_vm0 = vmmov 0   ;;  %vm242_vm1 = vcmask 1043456   ;;  %vm238_vm2 = vcmask 31744   ;;  %s457_s11 = sshll.u32 %s739_s27, 6 }
  0x7a   : > { %462 = vmatprep.subr.mxu0 %v752_v0  ;;  %464 = vmatprep.mubr.msk.f32.mxu0 %vm753_vm0, %v752_v0  ;;  %v237_v1 = vld [vmem:[%s198_s22] sm:$0xf]  ;;  %v236_v2 = vld [vmem:[%s207_s17] sm:$0xf]  ;;  %s232_s19 = scalar_lea.vmem [#allocation9], %s451_s4  ;;  %vm316_vm3 = vcmask 125952   ;;  %s1026_s30 = scalar_lea.hbm %s1087_s3, %s457_s11 }
  0x7b   : > { %463 = vmatpush3.msk.msra.mxu0 %vm242_vm1, %v237_v1  ;;  %s334_s12 = sshll.u32 %s232_s19, 4  ;;  %s319_s7 = scalar_lea.sflag [#allocation6], %s1009_s5  ;;  %s1028_s12 = int_to_ptr.vmem [resolvable:$true] %s334_s12 }
  0x7c   : > { %465 = vmatmul.mubr.msk.f32.vlgmr.msra.gmra.mrb[0].mxu0 %vm238_vm2, %v236_v2  ;;  %s635_s20 = scalar_lea.vmem %s1028_s12, 64  ;;  %p1114_p10 = scmp.ne.s32.totalorder %s1099_s14, 0 }
  0x7d   : > { %p636_p1 = scmp.ne.s32.totalorder %s1028_s12, %s635_s20  ;;  %s754_s27 = smov [#allocation9]  }
  0x7e   : > { %s639_s18 = sshll.u32 %s754_s27, 4  ;;  %s640_s18 = int_to_ptr.vmem [resolvable:$false] %s639_s18 }
  0x7f   : > { %p637_p2 = pnand %p636_p1, %p1114_p10  ;;  %s641_s4 = scalar_lea.vmem %s640_s18, 128 }
  0x80   : > { %p642_p3 = scmp.lt.s32.totalorder %s1028_s12, %s640_s18  ;;  %p643_p7 = scmp.lt.s32.totalorder %s641_s4, %s635_s20 }
  0x81   : > { %p638_p9 = pneg %p637_p2 }
  0x82   : > { %p644_p5 = por %p643_p7, %p642_p3 }
  0x84   : > { %p645_p8 = pnand %p644_p5, %p638_p9 }
 0x14f   : > { %v312_v3 = vpop.f32.mrb[0].mxu0 }
 0x150   : > { %317 = vst.msk [vmem:[%s232_s19] sm:$0xf] %vm316_vm3, %v312_v3  ;;  %v466_v4 = vpop.f32.mrb[1].mxu0 }
 0x151   : > { %648 = shalt.err (!%p645_p8)
}
 0x152   : > { %s649_s5 = scalar_lea.hbm %s1026_s30, 64  ;;  %s653_s1 = scalar_lea.hbm %s1087_s3, 128 }
 0x153   : > { %p650_p12 = scmp.ne.s32.totalorder %s1026_s30, %s649_s5  ;;  %p654_p11 = scmp.lt.u32.totalorder %s1026_s30, %s1087_s3 }
 0x154   : > { %p655_p13 = scmp.lt.u32.totalorder %s653_s1, %s649_s5  ;;  %p657_p1 = scmp.lt.u32.totalorder %s649_s5, %s1026_s30 }
 0x155   : > { %p651_p4 = pnand %p650_p12, %p1114_p10 }
 0x156   : > { %p656_p0 = por %p655_p13, %p654_p11 }
 0x157   : > { %p652_p6 = pneg %p651_p4 }
 0x158   : > { %p658_p2 = por %p657_p1, %p656_p0 }
 0x15a   : > { %p659_p9 = pnand %p658_p2, %p652_p6 }
 0x15c   : > { %662 = shalt.err (!%p659_p9)
}
 0x15d   : > { %473 = dma.vmem_to_hbm [thread:$0]  (%p1114_p10), %s1028_s12, 64, %s1026_s30, %s319_s7  }
 0x15e PF: > { %s346_s17 = sand.u32 1, %s727_s25   ;;  %p1115_p3 = scmp.ne.s32.totalorder %s1100_s15, 0 }
 0x15f   : > { %p1116_p7 = scmp.ge.s32.totalorder %s747_s29, 2  ;;  %s347_s11 = scalar_lea.sflag [#allocation6], %s346_s17 }
 0x161   : > { %p485_p5 = pnand %p1116_p7, %p1115_p3 }
 0x163   : > { %710 = dma.done.wait (!%p485_p5), %s347_s11, 64  }
 0x164   : > { %712 = vsyncadd (!%p485_p5), %s347_s11, 4294967232  ;;  %s26_s29 = sadd.s32 1, %s747_s29   ;;  %s1117_s14 = sld [smem:[#allocation16_spill]] }
 0x165   : > { %p23_p8 = scmp.ge.s32.totalorder %s26_s29, 4   ;;  %s1118_s22 = smov %s719_s23 }
 0x166   : > { %s1119_s23 = smov %s723_s24  ;;  %s1120_s24 = smov %s953_s16 }
 0x167   : > { %s1121_s25 = smov %s731_s26  ;;  %s1122_s26 = smov %s735_s0 }
 0x168   : > { %s1123_s0 = smov %s874_s13  ;;  %s1124_s27 = smov %s743_s28 }
 0x169   :  { %25 = sbr.rel (!%p23_p8) target bundleno = 22 (0x16), region = 86 }
 0x16a   : > { %s1125_s28 = smov %s1117_s14 }
 0x170   :  { %352 = vsyncpa [#allocation5], 1 }
 0x171   :  { %354 = vsyncpa [#allocation5 + $0x1], 1 }
 0x172   :  { %355 = vsyncpa [#allocation8], 1 }
 0x173   :  { %357 = vsyncpa [#allocation8 + $0x1], 1 }
 0x174   :  { %358 = vsyncpa [#allocation6], 1 }
 0x175   :  { %360 = vsyncpa [#allocation6 + $0x1], 1 }

</bundles_post_ra>
